<compile_context>
chip_gen: v5e
topology: v5e:2x2
jax: 0.10.0
libtpu: 0.0.40
codegen_flags: <defaults>
</compile_context>

<pallas_src>
import functools

import jax
import jax.numpy as jnp
from jax.experimental import pallas as pl
from jax.experimental.pallas import tpu as pltpu

LANE = 128  # output feature dim padded to a multiple of this (lane-dense store)


def _round_up(n, m):
    return ((n + m - 1) // m) * m


def mlp_kernel(x_ref, w1_ref, b1_ref, w2_ref, b2_ref, w3_ref, b3_ref, o_ref):
    # Layer 1: Linear + ReLU (bf16 operands, f32 accumulation, f32 epilogue).
    h1 = jnp.dot(x_ref[...], w1_ref[...], preferred_element_type=jnp.float32)
    h1 = jnp.maximum(h1 + b1_ref[...], 0.0)
    # Dropout(0.2) == identity in eval mode.

    # Layer 2: Linear + ReLU.
    h2 = jnp.dot(h1.astype(w2_ref.dtype), w2_ref[...],
                 preferred_element_type=jnp.float32)
    h2 = jnp.maximum(h2 + b2_ref[...], 0.0)
    # Dropout(0.2) == identity in eval mode.

    # Layer 3: Linear (no activation).
    out = jnp.dot(h2.astype(w3_ref.dtype), w3_ref[...],
                  preferred_element_type=jnp.float32)
    o_ref[...] = (out + b3_ref[...]).astype(o_ref.dtype)


def prepare_params(params, use_bf16=True):
    """One-time weight prep (run OUTSIDE the per-call path).

    Casts weights to the compute dtype and pads only the last layer's output
    dim to a 128-lane multiple (for the lane-dense output store). Returns
    (prepped_dict, out_dim).
    """
    cdt = jnp.bfloat16 if use_bf16 else jnp.float32
    w1, b1 = params["w1"], params["b1"]
    w2, b2 = params["w2"], params["b2"]
    w3, b3 = params["w3"], params["b3"]
    out_dim = w3.shape[1]
    out_p = _round_up(out_dim, LANE)

    prepped = {
        "w1": w1.astype(cdt),
        "b1": b1.astype(jnp.float32),  # biases stay f32 (f32 epilogue everywhere)
        "w2": w2.astype(cdt),
        "b2": b2.astype(jnp.float32),
        "w3": jnp.pad(w3, ((0, 0), (0, out_p - out_dim))).astype(cdt),
        "b3": jnp.pad(b3, ((0, 0), (0, out_p - out_dim))).astype(jnp.float32),
    }
    return prepped, out_dim


@functools.partial(jax.jit, static_argnames=("out_dim", "tile_m"))
def _forward_impl(x, prepped, out_dim, tile_m):
    w1, b1 = prepped["w1"], prepped["b1"]
    w2, b2 = prepped["w2"], prepped["b2"]
    w3, b3 = prepped["w3"], prepped["b3"]

    B, in_dim = x.shape
    hid = w1.shape[1]
    out_p = w3.shape[1]

    # Per-call prep on x only: pad batch to a tile multiple + cast to compute dtype.
    b_p = _round_up(B, tile_m)
    xp = jnp.pad(x, ((0, b_p - B), (0, 0))).astype(w1.dtype)

    grid = (b_p // tile_m,)

    flops = 2 * b_p * (in_dim * hid + hid * hid + hid * out_p)
    bytes_accessed = (
        xp.size * xp.dtype.itemsize
        + sum(a.size * a.dtype.itemsize for a in (w1, b1, w2, b2, w3, b3))
        + b_p * out_p * 4
    )

    def resident(shape):
        # Constant index_map -> a second buffer is wasted VMEM; single-buffer it.
        return pl.BlockSpec(shape, lambda i: (0, 0), pipeline_mode=pl.Buffered(1))

    out_padded = pl.pallas_call(
        mlp_kernel,
        out_shape=jax.ShapeDtypeStruct((b_p, out_p), jnp.float32),
        grid_spec=pltpu.PrefetchScalarGridSpec(
            num_scalar_prefetch=0,
            grid=grid,
            in_specs=[
                # x tiled over batch; weights/biases resident.
                pl.BlockSpec((tile_m, in_dim), lambda i: (i, 0)),
                resident((in_dim, hid)),
                resident((1, hid)),
                resident((hid, hid)),
                resident((1, hid)),
                resident((hid, out_p)),
                resident((1, out_p)),
            ],
            out_specs=pl.BlockSpec((tile_m, out_p), lambda i: (i, 0)),
        ),
        compiler_params=pltpu.CompilerParams(
            dimension_semantics=("parallel",),
            vmem_limit_bytes=64 * 1024 * 1024,
        ),
        cost_estimate=pl.CostEstimate(
            flops=flops, transcendentals=0, bytes_accessed=bytes_accessed),
    )(xp, w1, b1, w2, b2, w3, b3)

    # Strip batch / lane padding (f32 output for parity with the PyTorch model).
    return out_padded[:B, :out_dim]


def deep_learning_model_forward(x, prepped, out_dim, tile_m=256):
    """x: (B, input_size) f32. prepped/out_dim from prepare_params()."""
    # M=256 fills the v6e/v7x MXU; shrink the tile for tiny batches so a batch
    # of 8 isn't padded up to 256 (small batches then run as a single grid step,
    # which is also what single-TC v5e/v6e prefer).
    tile = min(tile_m, _round_up(x.shape[0], 8))
    return _forward_impl(x, prepped, out_dim, tile)


def init_params(key, input_size, hidden_size, output_size):
    """Init mimicking PyTorch Linear (U[-1/sqrt(fan_in), 1/sqrt(fan_in)]).
    Weights stored as (in_features, out_features) — PyTorch weight transposed."""
    def linear(key, fan_in, fan_out):
        kw, kb = jax.random.split(key)
        bound = 1.0 / jnp.sqrt(fan_in)
        w = jax.random.uniform(kw, (fan_in, fan_out), jnp.float32, -bound, bound)
        b = jax.random.uniform(kb, (1, fan_out), jnp.float32, -bound, bound)
        return w, b

    k1, k2, k3 = jax.random.split(key, 3)
    w1, b1 = linear(k1, input_size, hidden_size)
    w2, b2 = linear(k2, hidden_size, hidden_size)
    w3, b3 = linear(k3, hidden_size, output_size)
    return {"w1": w1, "b1": b1, "w2": w2, "b2": b2, "w3": w3, "b3": b3}


def reference_forward(x, params, use_bf16=True):
    """Pure-JAX reference using the same operand dtypes as the kernel."""
    cdt = jnp.bfloat16 if use_bf16 else jnp.float32
    h1 = jnp.dot(x.astype(cdt), params["w1"].astype(cdt),
                 preferred_element_type=jnp.float32) + params["b1"]
    h1 = jnp.maximum(h1, 0.0)
    h2 = jnp.dot(h1.astype(cdt), params["w2"].astype(cdt),
                 preferred_element_type=jnp.float32) + params["b2"]
    h2 = jnp.maximum(h2, 0.0)
    return jnp.dot(h2.astype(cdt), params["w3"].astype(cdt),
                   preferred_element_type=jnp.float32) + params["b3"]


if __name__ == "__main__":
    input_size, hidden_size, output_size = 32, 64, 16
    batch = 512  # 2 grid steps at tile_m=256: M=256 fills v6e/v7x MXU, both v7x TCs busy.

    key = jax.random.PRNGKey(0)
    kx, kp = jax.random.split(key)
    x = jax.random.normal(kx, (batch, input_size), jnp.float32)
    params = init_params(kp, input_size, hidden_size, output_size)

    # One-time weight prep (outside the per-call path).
    prepped, out_dim = prepare_params(params)

    out = deep_learning_model_forward(x, prepped, out_dim)
    out = jax.block_until_ready(out)

    ref = reference_forward(x, params)
    assert out.shape == (batch, output_size)
    assert jnp.allclose(out, ref, atol=1e-2, rtol=1e-2), "mismatch vs reference"
    print("KERNEL_OK")
</pallas_src>

<mosaic_0001>
module attributes {stable_mosaic.version = 11 : i64} {
  func.func @mlp_kernel(%arg0: i32, %arg1: memref<256x32xbf16, #tpu.memory_space<vmem>>, %arg2: memref<32x64xbf16, #tpu.memory_space<vmem>>, %arg3: memref<1x64xf32, #tpu.memory_space<vmem>>, %arg4: memref<64x64xbf16, #tpu.memory_space<vmem>>, %arg5: memref<1x64xf32, #tpu.memory_space<vmem>>, %arg6: memref<64x128xbf16, #tpu.memory_space<vmem>>, %arg7: memref<1x128xf32, #tpu.memory_space<vmem>>, %arg8: memref<256x128xf32, #tpu.memory_space<vmem>>) attributes {dimension_semantics = [#tpu.dimension_semantics<parallel>], iteration_bounds = array<i64: 2>, scalar_prefetch = 0 : i64, scratch_operands = 0 : i64, tpu.core_type = #tpu.core_type<tc>, window_params = [{transform_indices = @transform_0, window_bounds = array<i64: 256, 32>}, {pipeline_mode = #tpu.pipeline_mode<synchronous>, transform_indices = @transform_1, window_bounds = array<i64: 32, 64>}, {pipeline_mode = #tpu.pipeline_mode<synchronous>, transform_indices = @transform_2, window_bounds = array<i64: 1, 64>}, {pipeline_mode = #tpu.pipeline_mode<synchronous>, transform_indices = @transform_3, window_bounds = array<i64: 64, 64>}, {pipeline_mode = #tpu.pipeline_mode<synchronous>, transform_indices = @transform_4, window_bounds = array<i64: 1, 64>}, {pipeline_mode = #tpu.pipeline_mode<synchronous>, transform_indices = @transform_5, window_bounds = array<i64: 64, 128>}, {pipeline_mode = #tpu.pipeline_mode<synchronous>, transform_indices = @transform_6, window_bounds = array<i64: 1, 128>}, {transform_indices = @transform_7, window_bounds = array<i64: 256, 128>}]} {
    %c0 = arith.constant 0 : index
    %c0_0 = arith.constant 0 : index
    %0 = vector.load %arg1[%c0, %c0_0] : memref<256x32xbf16, #tpu.memory_space<vmem>>, vector<256x32xbf16>
    %c0_1 = arith.constant 0 : index
    %c0_2 = arith.constant 0 : index
    %1 = vector.load %arg2[%c0_1, %c0_2] : memref<32x64xbf16, #tpu.memory_space<vmem>>, vector<32x64xbf16>
    %cst = arith.constant dense<0.000000e+00> : vector<256x64xf32>
    %2 = tpu.matmul %0, %1, %cst {dimension_numbers = #tpu.dot_dimension_numbers<[1], [0], [0], [1], [0, 0, 1, 1], [], []>} : vector<256x32xbf16>, vector<32x64xbf16>, vector<256x64xf32> -> vector<256x64xf32>
    %c0_3 = arith.constant 0 : index
    %c0_4 = arith.constant 0 : index
    %3 = vector.load %arg3[%c0_3, %c0_4] : memref<1x64xf32, #tpu.memory_space<vmem>>, vector<1x64xf32>
    %4 = vector.broadcast %3 : vector<1x64xf32> to vector<256x64xf32>
    %5 = arith.addf %2, %4 : vector<256x64xf32>
    %cst_5 = arith.constant 0.000000e+00 : f32
    %6 = vector.broadcast %cst_5 : f32 to vector<256x64xf32>
    %7 = arith.maximumf %5, %6 : vector<256x64xf32>
    %8 = arith.truncf %7 : vector<256x64xf32> to vector<256x64xbf16>
    %c0_6 = arith.constant 0 : index
    %c0_7 = arith.constant 0 : index
    %9 = vector.load %arg4[%c0_6, %c0_7] : memref<64x64xbf16, #tpu.memory_space<vmem>>, vector<64x64xbf16>
    %cst_8 = arith.constant dense<0.000000e+00> : vector<256x64xf32>
    %10 = tpu.matmul %8, %9, %cst_8 {dimension_numbers = #tpu.dot_dimension_numbers<[1], [0], [0], [1], [0, 0, 1, 1], [], []>} : vector<256x64xbf16>, vector<64x64xbf16>, vector<256x64xf32> -> vector<256x64xf32>
    %c0_9 = arith.constant 0 : index
    %c0_10 = arith.constant 0 : index
    %11 = vector.load %arg5[%c0_9, %c0_10] : memref<1x64xf32, #tpu.memory_space<vmem>>, vector<1x64xf32>
    %12 = vector.broadcast %11 : vector<1x64xf32> to vector<256x64xf32>
    %13 = arith.addf %10, %12 : vector<256x64xf32>
    %cst_11 = arith.constant 0.000000e+00 : f32
    %14 = vector.broadcast %cst_11 : f32 to vector<256x64xf32>
    %15 = arith.maximumf %13, %14 : vector<256x64xf32>
    %16 = arith.truncf %15 : vector<256x64xf32> to vector<256x64xbf16>
    %c0_12 = arith.constant 0 : index
    %c0_13 = arith.constant 0 : index
    %17 = vector.load %arg6[%c0_12, %c0_13] : memref<64x128xbf16, #tpu.memory_space<vmem>>, vector<64x128xbf16>
    %cst_14 = arith.constant dense<0.000000e+00> : vector<256x128xf32>
    %18 = tpu.matmul %16, %17, %cst_14 {dimension_numbers = #tpu.dot_dimension_numbers<[1], [0], [0], [1], [0, 0, 1, 1], [], []>} : vector<256x64xbf16>, vector<64x128xbf16>, vector<256x128xf32> -> vector<256x128xf32>
    %c0_15 = arith.constant 0 : index
    %c0_16 = arith.constant 0 : index
    %19 = vector.load %arg7[%c0_15, %c0_16] : memref<1x128xf32, #tpu.memory_space<vmem>>, vector<1x128xf32>
    %20 = vector.broadcast %19 : vector<1x128xf32> to vector<256x128xf32>
    %21 = arith.addf %18, %20 : vector<256x128xf32>
    %c0_17 = arith.constant 0 : index
    %c0_18 = arith.constant 0 : index
    %22 = vector.load %arg8[%c0_17, %c0_18] : memref<256x128xf32, #tpu.memory_space<vmem>>, vector<256x128xf32>
    tpu.vector_store %arg8[%c0_17, %c0_18], %21 {strides = array<i32>} : memref<256x128xf32, #tpu.memory_space<vmem>>, vector<256x128xf32>,
    return
  }
  func.func @transform_0(%arg0: i32) -> (i32, i32) {
    %c0_i32 = arith.constant 0 : i32
    %c0_i32_0 = arith.constant 0 : i32
    return %arg0, %c0_i32 : i32, i32
  }
  func.func @transform_1(%arg0: i32) -> (i32, i32) {
    %c0_i32 = arith.constant 0 : i32
    %c0_i32_0 = arith.constant 0 : i32
    %c0_i32_1 = arith.constant 0 : i32
    return %c0_i32, %c0_i32_0 : i32, i32
  }
  func.func @transform_2(%arg0: i32) -> (i32, i32) {
    %c0_i32 = arith.constant 0 : i32
    %c0_i32_0 = arith.constant 0 : i32
    %c0_i32_1 = arith.constant 0 : i32
    return %c0_i32, %c0_i32_0 : i32, i32
  }
  func.func @transform_3(%arg0: i32) -> (i32, i32) {
    %c0_i32 = arith.constant 0 : i32
    %c0_i32_0 = arith.constant 0 : i32
    %c0_i32_1 = arith.constant 0 : i32
    return %c0_i32, %c0_i32_0 : i32, i32
  }
  func.func @transform_4(%arg0: i32) -> (i32, i32) {
    %c0_i32 = arith.constant 0 : i32
    %c0_i32_0 = arith.constant 0 : i32
    %c0_i32_1 = arith.constant 0 : i32
    return %c0_i32, %c0_i32_0 : i32, i32
  }
  func.func @transform_5(%arg0: i32) -> (i32, i32) {
    %c0_i32 = arith.constant 0 : i32
    %c0_i32_0 = arith.constant 0 : i32
    %c0_i32_1 = arith.constant 0 : i32
    return %c0_i32, %c0_i32_0 : i32, i32
  }
  func.func @transform_6(%arg0: i32) -> (i32, i32) {
    %c0_i32 = arith.constant 0 : i32
    %c0_i32_0 = arith.constant 0 : i32
    %c0_i32_1 = arith.constant 0 : i32
    return %c0_i32, %c0_i32_0 : i32, i32
  }
  func.func @transform_7(%arg0: i32) -> (i32, i32) {
    %c0_i32 = arith.constant 0 : i32
    %c0_i32_0 = arith.constant 0 : i32
    return %arg0, %c0_i32 : i32, i32
  }
}

</mosaic_0001>

<bundles_post_ra>
// kernel: _forward_impl.1
= control target key start
LH: loop header
LB: loop body
LE: loop exit
PB: predicated region body
PF: predicated region fallthrough
CT: control target
= control target key end

     0   :  { %s1342_s24 = smov 0   ;;  %s1604_s0 = inlined_call_operand.vmem [shape: bf16[512,32], index: 0, kind: input, shape index: {}]   ;;  %s1605_s1 = inlined_call_operand.vmem [shape: bf16[32,64], index: 1, kind: input, shape index: {}]   ;;  %s1606_s2 = inlined_call_operand.vmem [shape: f32[1,64], index: 2, kind: input, shape index: {}]   ;;  %s1607_s3 = inlined_call_operand.vmem [shape: bf16[64,64], index: 3, kind: input, shape index: {}]   ;;  %s1608_s4 = inlined_call_operand.vmem [shape: f32[1,64], index: 4, kind: input, shape index: {}]   ;;  %s1609_s5 = inlined_call_operand.vmem [shape: bf16[64,128], index: 5, kind: input, shape index: {}]   ;;  %s1610_s6 = inlined_call_operand.vmem [shape: f32[1,128], index: 6, kind: input, shape index: {}]   ;;  %s1611_s7 = inlined_call_operand.vmem [shape: f32[512,128], index: 7, kind: output, shape index: {}]  }
   0x1 LB: > { %s1084_s25 = sadd.s32 4294967295, %s1300_s24   ;;  %p1088_p0 = scmp.ge.s32.totalorder %s1300_s24, 1  ;;  %s1300_s24 = sphi %s1342_s24, %s17_s24  }
   0x2   : > { %p238_p1 = scmp.lt.s32.totalorder %s1300_s24, 3 }
   0x4   : > { %p239_p2 = pnand %p1088_p0, %p238_p1 }
   0x5   : > { %s1089_s28 = sshll.u32 (!%p239_p2), %s1084_s25, 5 }
   0x6   : > { %242 = sbr.rel (%p239_p2) target bundleno = 688 (0x2b0), region = 48  ;;  %p271_p3 = scmp.lt.s32.totalorder (!%p239_p2), %s1089_s28, 63 }
   0xb   : > { %v1264_v0 = vld [vmem:[%s1605_s1 + $0x8] sm:$0xff]  ;;  %v1263_v1 = vld [vmem:[%s1605_s1] sm:$0xff]  ;;  %s1613_s28 = smov (!%p271_p3, %s1089_s28), 63  ;;  %vm415_vm0 = vcmask 261120   ;;  %v1268_v8 = vld [vmem:[%s1607_s3 + $0x18] sm:$0xff]  ;;  %vm637_vm1 = vcmask 523264  }
   0xc   : > { %470 = vmatpush.bf16.msra.mxu0 %v1264_v0  ;;  %1273 = vmatpush.bf16.msra.mxu3 %v1264_v0  ;;  %s1090_s8 = sshll.u32 %s1613_s28, 2  ;;  %v1267_v10 = vld [vmem:[%s1607_s3 + $0x10] sm:$0xff]  ;;  %v1266_v11 = vld [vmem:[%s1607_s3 + $0x8] sm:$0xff]  ;;  %v1265_v12 = vld [vmem:[%s1607_s3] sm:$0xff] }
   0xd   : > { %s1362_s11 = scalar_lea.vmem %s1604_s0, %s1090_s8  ;;  %690 = vmatpush.bf16.msra.mxu1 %v1268_v8  ;;  %v1396_v16 = vld [vmem:[%s1606_s2] ss:$0 sm:$0xff] }
   0xe   : > { %v1247_v2 = vld [vmem:[%s1362_s11] sm:$0xff]  ;;  %v1248_v3 = vld [vmem:[%s1362_s11 + $0x8] sm:$0xff]  ;;  %v1249_v4 = vld [vmem:[%s1362_s11 + $0x10] sm:$0xff] }
   0xf   : > { %v1250_v5 = vld [vmem:[%s1362_s11 + $0x18] sm:$0xff]  ;;  %v1251_v6 = vld [vmem:[%s1362_s11 + $0x20] sm:$0xff]  ;;  %v1252_v7 = vld [vmem:[%s1362_s11 + $0x28] sm:$0xff] }
  0x10   : > { %471 = vmatpush.bf16.msra.mxu0 %v1263_v1  ;;  %1274 = vmatpush.bf16.msra.mxu3 %v1263_v1  ;;  %v1253_v9 = vld [vmem:[%s1362_s11 + $0x30] sm:$0xff]  ;;  %v1254_v13 = vld [vmem:[%s1362_s11 + $0x38] sm:$0xff]  ;;  %v1255_v14 = vld [vmem:[%s1362_s11 + $0x40] sm:$0xff] }
  0x11   : > { %691 = vmatpush.bf16.msra.mxu1 %v1267_v10  ;;  %v1256_v23 = vld [vmem:[%s1362_s11 + $0x48] sm:$0xff]  ;;  %v1257_v31 = vld [vmem:[%s1362_s11 + $0x50] sm:$0xff]  ;;  %v1258_v40 = vld [vmem:[%s1362_s11 + $0x58] sm:$0xff] }
  0x12   : > { %v1260_v33 = vld [vmem:[%s1362_s11 + $0x68] sm:$0xff]  ;;  %v1261_v42 = vld [vmem:[%s1362_s11 + $0x70] sm:$0xff]  ;;  %v1259_v49 = vld [vmem:[%s1362_s11 + $0x60] sm:$0xff] }
  0x13   : > { %1165 = vmatmul.msk.bf16.vlgmr.msra.gmra.mxu0 %vm415_vm0, %v1247_v2  ;;  %1178 = vmatmul.msk.bf16.vlgmr.msra.gmra.mxu3 %vm415_vm0, %v1260_v33  ;;  %v1262_v51 = vld [vmem:[%s1362_s11 + $0x78] sm:$0xff]  ;;  %s1092_s11 = sshll.u32 %s1613_s28, 3 }
  0x14   : > { %1275 = vmatpush.bf16.msrb.mxu3 %v1268_v8  ;;  %s1514_s16 = scalar_lea.vmem %s1611_s7, %s1092_s11 }
  0x15   : > { %692 = vmatpush.bf16.msra.mxu1 %v1266_v11 }
  0x18   : > { %1276 = vmatpush.bf16.msrb.mxu3 %v1267_v10 }
  0x19   : > { %693 = vmatpush.bf16.msra.mxu1 %v1265_v12 }
  0x1c   : > { %1277 = vmatpush.bf16.msrb.mxu3 %v1266_v11  ;;  %v1270_v11 = vld [vmem:[%s1609_s5 + $0x8] sm:$0xff] }
  0x20   : > { %1278 = vmatpush.bf16.msrb.mxu3 %v1265_v12  ;;  %v1269_v12 = vld [vmem:[%s1609_s5] sm:$0xff] }
  0x23   : > { %1166 = vmatmul.msk.bf16.gmra.mxu0 %vm415_vm0, %v1248_v3  ;;  %1179 = vmatmul.msk.bf16.gmra.mxu3 %vm415_vm0, %v1261_v42 }
  0x33   : > { %1167 = vmatmul.msk.bf16.gmra.mxu0 %vm415_vm0, %v1249_v4  ;;  %1180 = vmatmul.msk.bf16.gmra.mxu3 %vm415_vm0, %v1262_v51 }
  0x43   : > { %1168 = vmatmul.msk.bf16.gmra.mxu0 %vm415_vm0, %v1250_v5  ;;  %v1272_v5 = vld [vmem:[%s1609_s5 + $0x18] sm:$0xff] }
  0x44   : > { %911 = vmatpush.bf16.msra.mxu2 %v1272_v5  ;;  %1279 = vmatpush.bf16.msra.mxu3 %v1272_v5 }
  0x53   : > { %1169 = vmatmul.msk.bf16.gmra.mxu0 %vm415_vm0, %v1251_v6 }
  0x63   : > { %1170 = vmatmul.msk.bf16.gmra.mxu0 %vm415_vm0, %v1252_v7 }
  0x73   : > { %1171 = vmatmul.msk.bf16.gmra.mxu0 %vm415_vm0, %v1253_v9  ;;  %v1271_v9 = vld [vmem:[%s1609_s5 + $0x10] sm:$0xff] }
  0x74   : > { %912 = vmatpush.bf16.msra.mxu2 %v1271_v9  ;;  %1280 = vmatpush.bf16.msra.mxu3 %v1271_v9 }
  0x78   : > { %913 = vmatpush.bf16.msra.mxu2 %v1270_v11  ;;  %1281 = vmatpush.bf16.msra.mxu3 %v1270_v11 }
  0x7c   : > { %914 = vmatpush.bf16.msra.mxu2 %v1269_v12  ;;  %1282 = vmatpush.bf16.msra.mxu3 %v1269_v12 }
  0x83   : > { %1172 = vmatmul.msk.bf16.gmra.mxu0 %vm415_vm0, %v1254_v13 }
  0x90   : > { %v473_v15 = vpop.f32.mrf.mxu0 }
  0x91   : > { %v474_v17 = vadd.f32 %v1396_v16, %v473_v15 }
  0x93   : > { %1173 = vmatmul.msk.bf16.gmra.mxu0 %vm415_vm0, %v1255_v14  ;;  %v553_v20 = vmax.f32 %v474_v17, 0.0 }
  0x98   : > { %v475_v18 = vpop.f32.mrf.mxu0 }
  0x99   : > { %v476_v19 = vadd.f32 %v1396_v16, %v475_v18 }
  0x9b   : > { %v554_v21 = vmax.f32 %v476_v19, 0.0 }
  0x9d   : > { %v585_v22 = vpack.c.bf16 %v554_v21, %v553_v20 }
  0x9f   : > { %1197 = vmatmul.msk.bf16.vlgmr.msra.gmra.mxu1 %vm637_vm1, %v585_v22 }
  0xa0   : > { %v478_v24 = vpop.f32.mrf.mxu0 }
  0xa1   : > { %v479_v25 = vadd.f32 %v1396_v16, %v478_v24 }
  0xa3   : > { %1174 = vmatmul.msk.bf16.gmra.mxu0 %vm415_vm0, %v1256_v23  ;;  %v555_v28 = vmax.f32 %v479_v25, 0.0 }
  0xa8   : > { %v480_v26 = vpop.f32.mrf.mxu0 }
  0xa9   : > { %v481_v27 = vadd.f32 %v1396_v16, %v480_v26 }
  0xab   : > { %v556_v29 = vmax.f32 %v481_v27, 0.0 }
  0xad   : > { %v586_v30 = vpack.c.bf16 %v556_v29, %v555_v28  ;;  %v1454_v28 = vld [vmem:[%s1608_s4] ss:$0 sm:$0xff] }
  0xaf   : > { %1198 = vmatmul.msk.bf16.gmra.mxu1 %vm637_vm1, %v586_v30 }
  0xb0   : > { %v483_v32 = vpop.f32.mrf.mxu0 }
  0xb1   : > { %v484_v34 = vadd.f32 %v1396_v16, %v483_v32 }
  0xb3   : > { %1175 = vmatmul.msk.bf16.gmra.mxu0 %vm415_vm0, %v1257_v31  ;;  %v557_v37 = vmax.f32 %v484_v34, 0.0 }
  0xb8   : > { %v485_v35 = vpop.f32.mrf.mxu0 }
  0xb9   : > { %v486_v36 = vadd.f32 %v1396_v16, %v485_v35 }
  0xbb   : > { %v558_v38 = vmax.f32 %v486_v36, 0.0 }
  0xbd   : > { %v587_v39 = vpack.c.bf16 %v558_v38, %v557_v37 }
  0xbf   : > { %1199 = vmatmul.msk.bf16.gmra.mxu1 %vm637_vm1, %v587_v39 }
  0xc0   : > { %v488_v41 = vpop.f32.mrf.mxu0 }
  0xc1   : > { %v489_v43 = vadd.f32 %v1396_v16, %v488_v41 }
  0xc3   : > { %1176 = vmatmul.msk.bf16.gmra.mxu0 %vm415_vm0, %v1258_v40  ;;  %v559_v46 = vmax.f32 %v489_v43, 0.0 }
  0xc8   : > { %v490_v44 = vpop.f32.mrf.mxu0 }
  0xc9   : > { %v491_v45 = vadd.f32 %v1396_v16, %v490_v44 }
  0xcb   : > { %v560_v47 = vmax.f32 %v491_v45, 0.0 }
  0xcd   : > { %v588_v48 = vpack.c.bf16 %v560_v47, %v559_v46 }
  0xcf   : > { %1200 = vmatmul.msk.bf16.gmra.mxu1 %vm637_vm1, %v588_v48 }
  0xd0   : > { %v493_v50 = vpop.f32.mrf.mxu0 }
  0xd1   : > { %v494_v52 = vadd.f32 %v1396_v16, %v493_v50 }
  0xd3   : > { %1177 = vmatmul.msk.bf16.gmra.mxu0 %vm415_vm0, %v1259_v49  ;;  %v561_v55 = vmax.f32 %v494_v52, 0.0 }
  0xd8   : > { %v495_v53 = vpop.f32.mrf.mxu0 }
  0xd9   : > { %v496_v54 = vadd.f32 %v1396_v16, %v495_v53 }
  0xdb   : > { %v562_v56 = vmax.f32 %v496_v54, 0.0 }
  0xdd   : > { %v589_v57 = vpack.c.bf16 %v562_v56, %v561_v55 }
  0xdf   : > { %1201 = vmatmul.msk.bf16.gmra.mxu1 %vm637_vm1, %v589_v57 }
  0xe0   : > { %v498_v58 = vpop.f32.mrf.mxu0 }
  0xe1   : > { %v499_v59 = vadd.f32 %v1396_v16, %v498_v58 }
  0xe3   : > { %v563_v62 = vmax.f32 %v499_v59, 0.0 }
  0xe8   : > { %v500_v60 = vpop.f32.mrf.mxu0 }
  0xe9   : > { %v501_v61 = vadd.f32 %v1396_v16, %v500_v60 }
  0xeb   : > { %v564_v63 = vmax.f32 %v501_v61, 0.0 }
  0xed   : > { %v590_v0 = vpack.c.bf16 %v564_v63, %v563_v62 }
  0xef   : > { %1202 = vmatmul.msk.bf16.gmra.mxu1 %vm637_vm1, %v590_v0 }
  0xf0   : > { %v503_v1 = vpop.f32.mrf.mxu0 }
  0xf1   : > { %v504_v2 = vadd.f32 %v1396_v16, %v503_v1 }
  0xf3   : > { %v565_v6 = vmax.f32 %v504_v2, 0.0 }
  0xf8   : > { %v505_v3 = vpop.f32.mrf.mxu0 }
  0xf9   : > { %v506_v4 = vadd.f32 %v1396_v16, %v505_v3 }
  0xfb   : > { %v566_v7 = vmax.f32 %v506_v4, 0.0 }
  0xfd   : > { %v591_v8 = vpack.c.bf16 %v566_v7, %v565_v6 }
  0xff   : > { %1203 = vmatmul.msk.bf16.gmra.mxu1 %vm637_vm1, %v591_v8  ;;  %v538_v8 = vpop.f32.mrf.mxu3 }
 0x100   : > { %v508_v10 = vpop.f32.mrf.mxu0 }
 0x101   : > { %v509_v13 = vadd.f32 %v1396_v16, %v508_v10 }
 0x103   : > { %v567_v17 = vmax.f32 %v509_v13, 0.0 }
 0x108   : > { %v510_v14 = vpop.f32.mrf.mxu0 }
 0x109   : > { %v511_v15 = vadd.f32 %v1396_v16, %v510_v14 }
 0x10b   : > { %v568_v18 = vmax.f32 %v511_v15, 0.0 }
 0x10d   : > { %v592_v19 = vpack.c.bf16 %v568_v18, %v567_v17 }
 0x10f   : > { %1204 = vmatmul.msk.bf16.gmra.mxu1 %vm637_vm1, %v592_v19  ;;  %v540_v19 = vpop.f32.mrf.mxu3 }
 0x110   : > { %v513_v20 = vpop.f32.mrf.mxu0 }
 0x111   : > { %v514_v21 = vadd.f32 %v1396_v16, %v513_v20 }
 0x113   : > { %v569_v24 = vmax.f32 %v514_v21, 0.0 }
 0x118   : > { %v515_v22 = vpop.f32.mrf.mxu0 }
 0x119   : > { %v516_v23 = vadd.f32 %v1396_v16, %v515_v22 }
 0x11b   : > { %v570_v25 = vmax.f32 %v516_v23, 0.0 }
 0x11c   : > { %v695_v26 = vpop.f32.mrf.mxu1 }
 0x11d   : > { %v593_v27 = vpack.c.bf16 %v570_v25, %v569_v24  ;;  %v696_v30 = vadd.f32 %v1454_v28, %v695_v26  ;;  %v543_v26 = vpop.f32.mrf.mxu3 }
 0x11f   : > { %1205 = vmatmul.msk.bf16.gmra.mxu1 %vm637_vm1, %v593_v27  ;;  %v775_v33 = vmax.f32 %v696_v30, 0.0  ;;  %v539_v27 = vadd.f32 %v1396_v16, %v538_v8 }
 0x120   : > { %v518_v29 = vpop.f32.mrf.mxu0 }
 0x121   : > { %v519_v34 = vadd.f32 %v1396_v16, %v518_v29  ;;  %v541_v29 = vadd.f32 %v1396_v16, %v540_v19 }
 0x123   : > { %v571_v39 = vmax.f32 %v519_v34, 0.0  ;;  %v580_v34 = vmax.f32 %v541_v29, 0.0 }
 0x124   : > { %v697_v31 = vpop.f32.mrf.mxu1 }
 0x125   : > { %v698_v32 = vadd.f32 %v1454_v28, %v697_v31 }
 0x127   : > { %v776_v35 = vmax.f32 %v698_v32, 0.0 }
 0x128   : > { %v520_v36 = vpop.f32.mrf.mxu0 }
 0x129   : > { %v807_v37 = vpack.c.bf16 %v776_v35, %v775_v33  ;;  %v521_v38 = vadd.f32 %v1396_v16, %v520_v36  ;;  %v579_v33 = vmax.f32 %v539_v27, 0.0 }
 0x12b   : > { %v572_v40 = vmax.f32 %v521_v38, 0.0  ;;  %1229 = vmatmul.msk.bf16.vlgmr.msra.gmra.mxu2 %vm637_vm1, %v807_v37  ;;  %v598_v37 = vpack.c.bf16 %v580_v34, %v579_v33  ;;  %v545_v38 = vpop.f32.mrf.mxu3 }
 0x12c   : > { %v700_v41 = vpop.f32.mrf.mxu1 }
 0x12d   : > { %v594_v42 = vpack.c.bf16 %v572_v40, %v571_v39  ;;  %v701_v44 = vadd.f32 %v1454_v28, %v700_v41  ;;  %v544_v41 = vadd.f32 %v1396_v16, %v543_v26 }
 0x12f   : > { %1206 = vmatmul.msk.bf16.gmra.mxu1 %vm637_vm1, %v594_v42  ;;  %v777_v47 = vmax.f32 %v701_v44, 0.0  ;;  %v546_v42 = vadd.f32 %v1396_v16, %v545_v38 }
 0x130   : > { %v523_v43 = vpop.f32.mrf.mxu0 }
 0x131   : > { %v524_v48 = vadd.f32 %v1396_v16, %v523_v43 }
 0x133   : > { %v573_v53 = vmax.f32 %v524_v48, 0.0  ;;  %v582_v48 = vmax.f32 %v546_v42, 0.0 }
 0x134   : > { %v702_v45 = vpop.f32.mrf.mxu1 }
 0x135   : > { %v703_v46 = vadd.f32 %v1454_v28, %v702_v45 }
 0x137   : > { %v778_v49 = vmax.f32 %v703_v46, 0.0  ;;  %v548_v46 = vpop.f32.mrf.mxu3 }
 0x138   : > { %v525_v50 = vpop.f32.mrf.mxu0 }
 0x139   : > { %v808_v51 = vpack.c.bf16 %v778_v49, %v777_v47  ;;  %v526_v52 = vadd.f32 %v1396_v16, %v525_v50  ;;  %v581_v47 = vmax.f32 %v544_v41, 0.0 }
 0x13b   : > { %v574_v54 = vmax.f32 %v526_v52, 0.0  ;;  %1230 = vmatmul.msk.bf16.gmra.mxu2 %vm637_vm1, %v808_v51  ;;  %v599_v51 = vpack.c.bf16 %v582_v48, %v581_v47 }
 0x13c   : > { %v705_v55 = vpop.f32.mrf.mxu1 }
 0x13d   : > { %v595_v56 = vpack.c.bf16 %v574_v54, %v573_v53  ;;  %v706_v58 = vadd.f32 %v1454_v28, %v705_v55  ;;  %v549_v55 = vadd.f32 %v1396_v16, %v548_v46 }
 0x13f   : > { %1207 = vmatmul.msk.bf16.gmra.mxu1 %vm637_vm1, %v595_v56  ;;  %v779_v61 = vmax.f32 %v706_v58, 0.0  ;;  %v550_v52 = vpop.f32.mrf.mxu3 }
 0x140   : > { %v528_v57 = vpop.f32.mrf.mxu0  ;;  %v551_v56 = vadd.f32 %v1396_v16, %v550_v52 }
 0x141   : > { %v529_v62 = vadd.f32 %v1396_v16, %v528_v57 }
 0x143   : > { %v575_v3 = vmax.f32 %v529_v62, 0.0 }
 0x144   : > { %v707_v59 = vpop.f32.mrf.mxu1 }
 0x145   : > { %v708_v60 = vadd.f32 %v1454_v28, %v707_v59 }
 0x147   : > { %v780_v63 = vmax.f32 %v708_v60, 0.0  ;;  %v583_v60 = vmax.f32 %v549_v55, 0.0 }
 0x148   : > { %v530_v0 = vpop.f32.mrf.mxu0 }
 0x149   : > { %v809_v1 = vpack.c.bf16 %v780_v63, %v779_v61  ;;  %v531_v2 = vadd.f32 %v1396_v16, %v530_v0  ;;  %v584_v61 = vmax.f32 %v551_v56, 0.0 }
 0x14b   : > { %v576_v4 = vmax.f32 %v531_v2, 0.0  ;;  %1231 = vmatmul.msk.bf16.gmra.mxu2 %vm637_vm1, %v809_v1  ;;  %v600_v0 = vpack.c.bf16 %v584_v61, %v583_v60 }
 0x14c   : > { %v710_v5 = vpop.f32.mrf.mxu1 }
 0x14d   : > { %v596_v6 = vpack.c.bf16 %v576_v4, %v575_v3  ;;  %v711_v9 = vadd.f32 %v1454_v28, %v710_v5 }
 0x14f   : > { %1208 = vmatmul.msk.bf16.gmra.mxu1 %vm637_vm1, %v596_v6  ;;  %v781_v12 = vmax.f32 %v711_v9, 0.0 }
 0x150   : > { %v533_v7 = vpop.f32.mrf.mxu0 }
 0x151   : > { %v534_v13 = vadd.f32 %v1396_v16, %v533_v7 }
 0x153   : > { %v577_v20 = vmax.f32 %v534_v13, 0.0  ;;  %v1509_v13 = vld [vmem:[%s1610_s6] ss:$0 sm:$0xff] }
 0x154   : > { %v712_v10 = vpop.f32.mrf.mxu1 }
 0x155   : > { %v713_v11 = vadd.f32 %v1454_v28, %v712_v10 }
 0x157   : > { %v782_v14 = vmax.f32 %v713_v11, 0.0 }
 0x158   : > { %v535_v15 = vpop.f32.mrf.mxu0 }
 0x159   : > { %v810_v17 = vpack.c.bf16 %v782_v14, %v781_v12  ;;  %v536_v18 = vadd.f32 %v1396_v16, %v535_v15 }
 0x15b   : > { %v578_v21 = vmax.f32 %v536_v18, 0.0  ;;  %1232 = vmatmul.msk.bf16.gmra.mxu2 %vm637_vm1, %v810_v17 }
 0x15c   : > { %v715_v22 = vpop.f32.mrf.mxu1 }
 0x15d   : > { %v597_v23 = vpack.c.bf16 %v578_v21, %v577_v20  ;;  %v716_v24 = vadd.f32 %v1454_v28, %v715_v22 }
 0x15f   : > { %1209 = vmatmul.msk.bf16.vlgmr.msrb.gmra.mxu3 %vm637_vm1, %v597_v23  ;;  %v783_v31 = vmax.f32 %v716_v24, 0.0 }
 0x164   : > { %v717_v25 = vpop.f32.mrf.mxu1 }
 0x165   : > { %v718_v30 = vadd.f32 %v1454_v28, %v717_v25 }
 0x167   : > { %v784_v32 = vmax.f32 %v718_v30, 0.0 }
 0x169   : > { %v811_v35 = vpack.c.bf16 %v784_v32, %v783_v31 }
 0x16b   : > { %1233 = vmatmul.msk.bf16.gmra.mxu2 %vm637_vm1, %v811_v35 }
 0x16c   : > { %v720_v36 = vpop.f32.mrf.mxu1 }
 0x16d   : > { %v721_v39 = vadd.f32 %v1454_v28, %v720_v36 }
 0x16f   : > { %1210 = vmatmul.msk.bf16.gmra.mxu3 %vm637_vm1, %v598_v37  ;;  %v785_v44 = vmax.f32 %v721_v39, 0.0 }
 0x174   : > { %v722_v40 = vpop.f32.mrf.mxu1 }
 0x175   : > { %v723_v43 = vadd.f32 %v1454_v28, %v722_v40 }
 0x177   : > { %v786_v45 = vmax.f32 %v723_v43, 0.0 }
 0x179   : > { %v812_v49 = vpack.c.bf16 %v786_v45, %v785_v44 }
 0x17b   : > { %1234 = vmatmul.msk.bf16.gmra.mxu2 %vm637_vm1, %v812_v49 }
 0x17c   : > { %v725_v50 = vpop.f32.mrf.mxu1 }
 0x17d   : > { %v726_v53 = vadd.f32 %v1454_v28, %v725_v50 }
 0x17f   : > { %1211 = vmatmul.msk.bf16.gmra.mxu3 %vm637_vm1, %v599_v51  ;;  %v787_v58 = vmax.f32 %v726_v53, 0.0 }
 0x184   : > { %v727_v54 = vpop.f32.mrf.mxu1 }
 0x185   : > { %v728_v57 = vadd.f32 %v1454_v28, %v727_v54 }
 0x187   : > { %v788_v59 = vmax.f32 %v728_v57, 0.0 }
 0x189   : > { %v813_v62 = vpack.c.bf16 %v788_v59, %v787_v58 }
 0x18b   : > { %1235 = vmatmul.msk.bf16.gmra.mxu2 %vm637_vm1, %v813_v62 }
 0x18c   : > { %v730_v63 = vpop.f32.mrf.mxu1 }
 0x18d   : > { %v731_v1 = vadd.f32 %v1454_v28, %v730_v63 }
 0x18f   : > { %1212 = vmatmul.msk.bf16.gmra.mxu3 %vm637_vm1, %v600_v0  ;;  %v789_v16 = vmax.f32 %v731_v1, 0.0 }
 0x194   : > { %v732_v2 = vpop.f32.mrf.mxu1 }
 0x195   : > { %v733_v3 = vadd.f32 %v1454_v28, %v732_v2 }
 0x197   : > { %v790_v4 = vmax.f32 %v733_v3, 0.0 }
 0x199   : > { %v814_v5 = vpack.c.bf16 %v790_v4, %v789_v16 }
 0x19b   : > { %1236 = vmatmul.msk.bf16.gmra.mxu2 %vm637_vm1, %v814_v5 }
 0x19c   : > { %v735_v6 = vpop.f32.mrf.mxu1 }
 0x19d   : > { %v736_v7 = vadd.f32 %v1454_v28, %v735_v6 }
 0x19f   : > { %v791_v10 = vmax.f32 %v736_v7, 0.0 }
 0x1a4   : > { %v737_v8 = vpop.f32.mrf.mxu1 }
 0x1a5   : > { %v738_v9 = vadd.f32 %v1454_v28, %v737_v8 }
 0x1a7   : > { %v792_v11 = vmax.f32 %v738_v9, 0.0 }
 0x1a9   : > { %v815_v12 = vpack.c.bf16 %v792_v11, %v791_v10 }
 0x1ab   : > { %1237 = vmatmul.msk.bf16.gmra.mxu2 %vm637_vm1, %v815_v12 }
 0x1ac   : > { %v740_v14 = vpop.f32.mrf.mxu1 }
 0x1ad   : > { %v741_v18 = vadd.f32 %v1454_v28, %v740_v14 }
 0x1ae   : > { %v916_v15 = vpop.f32.mrf.mxu2 }
 0x1af   : > { %v917_v17 = vadd.f32 %v1509_v13, %v916_v15  ;;  %v793_v22 = vmax.f32 %v741_v18, 0.0 }
 0x1b1   : > { %996 = vst [vmem:[%s1514_s16] sm:$0xff] %v917_v17 }
 0x1b4   : > { %v742_v19 = vpop.f32.mrf.mxu1 }
 0x1b5   : > { %v743_v20 = vadd.f32 %v1454_v28, %v742_v19 }
 0x1b6   : > { %v918_v21 = vpop.f32.mrf.mxu2 }
 0x1b7   : > { %v794_v23 = vmax.f32 %v743_v20, 0.0  ;;  %v919_v24 = vadd.f32 %v1509_v13, %v918_v21 }
 0x1b9   : > { %v816_v25 = vpack.c.bf16 %v794_v23, %v793_v22  ;;  %997 = vst [vmem:[%s1514_s16 + $0x8] sm:$0xff] %v919_v24 }
 0x1bb   : > { %1238 = vmatmul.msk.bf16.gmra.mxu2 %vm637_vm1, %v816_v25 }
 0x1bc   : > { %v745_v26 = vpop.f32.mrf.mxu1 }
 0x1bd   : > { %v746_v30 = vadd.f32 %v1454_v28, %v745_v26 }
 0x1be   : > { %v921_v27 = vpop.f32.mrf.mxu2 }
 0x1bf   : > { %v922_v29 = vadd.f32 %v1509_v13, %v921_v27  ;;  %v795_v34 = vmax.f32 %v746_v30, 0.0 }
 0x1c1   : > { %998 = vst [vmem:[%s1514_s16 + $0x10] sm:$0xff] %v922_v29 }
 0x1c4   : > { %v747_v31 = vpop.f32.mrf.mxu1 }
 0x1c5   : > { %v748_v32 = vadd.f32 %v1454_v28, %v747_v31 }
 0x1c6   : > { %v923_v33 = vpop.f32.mrf.mxu2 }
 0x1c7   : > { %v796_v35 = vmax.f32 %v748_v32, 0.0  ;;  %v924_v36 = vadd.f32 %v1509_v13, %v923_v33 }
 0x1c9   : > { %v817_v37 = vpack.c.bf16 %v796_v35, %v795_v34  ;;  %999 = vst [vmem:[%s1514_s16 + $0x18] sm:$0xff] %v924_v36 }
 0x1cb   : > { %1239 = vmatmul.msk.bf16.gmra.mxu2 %vm637_vm1, %v817_v37 }
 0x1cc   : > { %v750_v38 = vpop.f32.mrf.mxu1 }
 0x1cd   : > { %v751_v41 = vadd.f32 %v1454_v28, %v750_v38 }
 0x1ce   : > { %v926_v39 = vpop.f32.mrf.mxu2 }
 0x1cf   : > { %v927_v40 = vadd.f32 %v1509_v13, %v926_v39  ;;  %v797_v45 = vmax.f32 %v751_v41, 0.0 }
 0x1d1   : > { %1000 = vst [vmem:[%s1514_s16 + $0x20] sm:$0xff] %v927_v40 }
 0x1d4   : > { %v752_v42 = vpop.f32.mrf.mxu1 }
 0x1d5   : > { %v753_v43 = vadd.f32 %v1454_v28, %v752_v42 }
 0x1d6   : > { %v928_v44 = vpop.f32.mrf.mxu2 }
 0x1d7   : > { %v798_v46 = vmax.f32 %v753_v43, 0.0  ;;  %v929_v47 = vadd.f32 %v1509_v13, %v928_v44 }
 0x1d9   : > { %v818_v48 = vpack.c.bf16 %v798_v46, %v797_v45  ;;  %1001 = vst [vmem:[%s1514_s16 + $0x28] sm:$0xff] %v929_v47 }
 0x1db   : > { %1240 = vmatmul.msk.bf16.gmra.mxu2 %vm637_vm1, %v818_v48 }
 0x1de   : > { %v931_v49 = vpop.f32.mrf.mxu2 }
 0x1df   : > { %v932_v50 = vadd.f32 %v1509_v13, %v931_v49 }
 0x1e1   : > { %1002 = vst [vmem:[%s1514_s16 + $0x30] sm:$0xff] %v932_v50 }
 0x1e2   : > { %v755_v51 = vpop.f32.mrf.mxu3 }
 0x1e3   : > { %v756_v54 = vadd.f32 %v1454_v28, %v755_v51 }
 0x1e5   : > { %v799_v57 = vmax.f32 %v756_v54, 0.0 }
 0x1e6   : > { %v933_v52 = vpop.f32.mrf.mxu2 }
 0x1e7   : > { %v934_v53 = vadd.f32 %v1509_v13, %v933_v52 }
 0x1e9   : > { %1003 = vst [vmem:[%s1514_s16 + $0x38] sm:$0xff] %v934_v53 }
 0x1ea   : > { %v757_v55 = vpop.f32.mrf.mxu3 }
 0x1eb   : > { %v758_v56 = vadd.f32 %v1454_v28, %v757_v55 }
 0x1ed   : > { %v800_v58 = vmax.f32 %v758_v56, 0.0 }
 0x1ee   : > { %v936_v59 = vpop.f32.mrf.mxu2 }
 0x1ef   : > { %v819_v60 = vpack.c.bf16 %v800_v58, %v799_v57  ;;  %v937_v61 = vadd.f32 %v1509_v13, %v936_v59 }
 0x1f1   : > { %1004 = vst [vmem:[%s1514_s16 + $0x40] sm:$0xff] %v937_v61  ;;  %1241 = vmatmul.msk.bf16.vlgmr.msra.gmra.mxu3 %vm637_vm1, %v819_v60 }
 0x1f2   : > { %v760_v62 = vpop.f32.mrf.mxu3 }
 0x1f3   : > { %v761_v1 = vadd.f32 %v1454_v28, %v760_v62 }
 0x1f5   : > { %v801_v16 = vmax.f32 %v761_v1, 0.0 }
 0x1f6   : > { %v938_v63 = vpop.f32.mrf.mxu2 }
 0x1f7   : > { %v939_v0 = vadd.f32 %v1509_v13, %v938_v63 }
 0x1f9   : > { %1005 = vst [vmem:[%s1514_s16 + $0x48] sm:$0xff] %v939_v0 }
 0x1fa   : > { %v762_v2 = vpop.f32.mrf.mxu3 }
 0x1fb   : > { %v763_v3 = vadd.f32 %v1454_v28, %v762_v2 }
 0x1fd   : > { %v802_v4 = vmax.f32 %v763_v3, 0.0 }
 0x1fe   : > { %v941_v5 = vpop.f32.mrf.mxu2 }
 0x1ff   : > { %v820_v6 = vpack.c.bf16 %v802_v4, %v801_v16  ;;  %v942_v7 = vadd.f32 %v1509_v13, %v941_v5 }
 0x201   : > { %1006 = vst [vmem:[%s1514_s16 + $0x50] sm:$0xff] %v942_v7  ;;  %1242 = vmatmul.msk.bf16.gmra.mxu3 %vm637_vm1, %v820_v6 }
 0x202   : > { %v765_v8 = vpop.f32.mrf.mxu3 }
 0x203   : > { %v766_v11 = vadd.f32 %v1454_v28, %v765_v8 }
 0x205   : > { %v803_v15 = vmax.f32 %v766_v11, 0.0 }
 0x206   : > { %v943_v9 = vpop.f32.mrf.mxu2 }
 0x207   : > { %v944_v10 = vadd.f32 %v1509_v13, %v943_v9 }
 0x209   : > { %1007 = vst [vmem:[%s1514_s16 + $0x58] sm:$0xff] %v944_v10 }
 0x20a   : > { %v767_v12 = vpop.f32.mrf.mxu3 }
 0x20b   : > { %v768_v14 = vadd.f32 %v1454_v28, %v767_v12 }
 0x20d   : > { %v804_v17 = vmax.f32 %v768_v14, 0.0 }
 0x20e   : > { %v946_v18 = vpop.f32.mrf.mxu2 }
 0x20f   : > { %v821_v19 = vpack.c.bf16 %v804_v17, %v803_v15  ;;  %v947_v20 = vadd.f32 %v1509_v13, %v946_v18 }
 0x211   : > { %1008 = vst [vmem:[%s1514_s16 + $0x60] sm:$0xff] %v947_v20  ;;  %1243 = vmatmul.msk.bf16.gmra.mxu3 %vm637_vm1, %v821_v19 }
 0x212   : > { %v770_v21 = vpop.f32.mrf.mxu3 }
 0x213   : > { %v771_v24 = vadd.f32 %v1454_v28, %v770_v21 }
 0x215   : > { %v805_v27 = vmax.f32 %v771_v24, 0.0 }
 0x216   : > { %v948_v22 = vpop.f32.mrf.mxu2 }
 0x217   : > { %v949_v23 = vadd.f32 %v1509_v13, %v948_v22 }
 0x219   : > { %1009 = vst [vmem:[%s1514_s16 + $0x68] sm:$0xff] %v949_v23 }
 0x21a   : > { %v772_v25 = vpop.f32.mrf.mxu3 }
 0x21b   : > { %v773_v26 = vadd.f32 %v1454_v28, %v772_v25 }
 0x21d   : > { %v806_v29 = vmax.f32 %v773_v26, 0.0 }
 0x21e   : > { %v951_v30 = vpop.f32.mrf.mxu2 }
 0x21f   : > { %v822_v31 = vpack.c.bf16 %v806_v29, %v805_v27  ;;  %v952_v32 = vadd.f32 %v1509_v13, %v951_v30 }
 0x221   : > { %1010 = vst [vmem:[%s1514_s16 + $0x70] sm:$0xff] %v952_v32  ;;  %1244 = vmatmul.msk.bf16.gmra.mxu3 %vm637_vm1, %v822_v31 }
 0x226   : > { %v953_v33 = vpop.f32.mrf.mxu2 }
 0x227   : > { %v954_v34 = vadd.f32 %v1509_v13, %v953_v33 }
 0x229   : > { %1011 = vst [vmem:[%s1514_s16 + $0x78] sm:$0xff] %v954_v34 }
 0x22e   : > { %v956_v35 = vpop.f32.mrf.mxu2 }
 0x22f   : > { %v957_v28 = vadd.f32 %v1509_v13, %v956_v35 }
 0x231   : > { %1012 = vst [vmem:[%s1514_s16 + $0x80] sm:$0xff] %v957_v28 }
 0x236   : > { %v958_v36 = vpop.f32.mrf.mxu2 }
 0x237   : > { %v959_v37 = vadd.f32 %v1509_v13, %v958_v36 }
 0x239   : > { %1013 = vst [vmem:[%s1514_s16 + $0x88] sm:$0xff] %v959_v37 }
 0x23e   : > { %v961_v38 = vpop.f32.mrf.mxu2 }
 0x23f   : > { %v962_v39 = vadd.f32 %v1509_v13, %v961_v38 }
 0x241   : > { %1014 = vst [vmem:[%s1514_s16 + $0x90] sm:$0xff] %v962_v39 }
 0x246   : > { %v963_v40 = vpop.f32.mrf.mxu2 }
 0x247   : > { %v964_v41 = vadd.f32 %v1509_v13, %v963_v40 }
 0x249   : > { %1015 = vst [vmem:[%s1514_s16 + $0x98] sm:$0xff] %v964_v41 }
 0x24e   : > { %v966_v42 = vpop.f32.mrf.mxu2 }
 0x24f   : > { %v967_v43 = vadd.f32 %v1509_v13, %v966_v42 }
 0x251   : > { %1016 = vst [vmem:[%s1514_s16 + $0xa0] sm:$0xff] %v967_v43 }
 0x256   : > { %v968_v44 = vpop.f32.mrf.mxu2 }
 0x257   : > { %v969_v45 = vadd.f32 %v1509_v13, %v968_v44 }
 0x259   : > { %1017 = vst [vmem:[%s1514_s16 + $0xa8] sm:$0xff] %v969_v45 }
 0x25e   : > { %v971_v46 = vpop.f32.mrf.mxu2 }
 0x25f   : > { %v972_v47 = vadd.f32 %v1509_v13, %v971_v46 }
 0x261   : > { %1018 = vst [vmem:[%s1514_s16 + $0xb0] sm:$0xff] %v972_v47 }
 0x266   : > { %v973_v48 = vpop.f32.mrf.mxu2 }
 0x267   : > { %v974_v49 = vadd.f32 %v1509_v13, %v973_v48 }
 0x269   : > { %1019 = vst [vmem:[%s1514_s16 + $0xb8] sm:$0xff] %v974_v49 }
 0x274   : > { %v976_v50 = vpop.f32.mrf.mxu3 }
 0x275   : > { %v977_v51 = vadd.f32 %v1509_v13, %v976_v50 }
 0x277   : > { %1020 = vst [vmem:[%s1514_s16 + $0xc0] sm:$0xff] %v977_v51 }
 0x27c   : > { %v978_v52 = vpop.f32.mrf.mxu3 }
 0x27d   : > { %v979_v53 = vadd.f32 %v1509_v13, %v978_v52 }
 0x27f   : > { %1021 = vst [vmem:[%s1514_s16 + $0xc8] sm:$0xff] %v979_v53 }
 0x284   : > { %v981_v54 = vpop.f32.mrf.mxu3 }
 0x285   : > { %v982_v55 = vadd.f32 %v1509_v13, %v981_v54 }
 0x287   : > { %1022 = vst [vmem:[%s1514_s16 + $0xd0] sm:$0xff] %v982_v55 }
 0x28c   : > { %v983_v56 = vpop.f32.mrf.mxu3 }
 0x28d   : > { %v984_v57 = vadd.f32 %v1509_v13, %v983_v56 }
 0x28f   : > { %1023 = vst [vmem:[%s1514_s16 + $0xd8] sm:$0xff] %v984_v57 }
 0x294   : > { %v986_v58 = vpop.f32.mrf.mxu3 }
 0x295   : > { %v987_v59 = vadd.f32 %v1509_v13, %v986_v58 }
 0x297   : > { %1024 = vst [vmem:[%s1514_s16 + $0xe0] sm:$0xff] %v987_v59 }
 0x29c   : > { %v988_v60 = vpop.f32.mrf.mxu3 }
 0x29d   : > { %v989_v61 = vadd.f32 %v1509_v13, %v988_v60 }
 0x29f   : > { %1025 = vst [vmem:[%s1514_s16 + $0xe8] sm:$0xff] %v989_v61 }
 0x2a4   : > { %v991_v62 = vpop.f32.mrf.mxu3 }
 0x2a5   : > { %v992_v63 = vadd.f32 %v1509_v13, %v991_v62 }
 0x2a7   : > { %1026 = vst [vmem:[%s1514_s16 + $0xf0] sm:$0xff] %v992_v63 }
 0x2ac   : > { %v993_v0 = vpop.f32.mrf.mxu3 }
 0x2ad   : > { %v994_v1 = vadd.f32 %v1509_v13, %v993_v0 }
 0x2af   : > { %1027 = vst [vmem:[%s1514_s16 + $0xf8] sm:$0xff] %v994_v1 }
 0x2b0 PF: > { %s17_s24 = sadd.s32 1, %s1300_s24  }
 0x2b1   : > { %p14_p4 = scmp.ge.s32.totalorder %s17_s24, 4  }
 0x2b3   :  { %16 = sbr.rel (!%p14_p4) target bundleno = 1 (0x1), region = 78 }

</bundles_post_ra>
